<compile_context>
chip_gen: v6e
topology: v6e:2x2x1
jax: 0.10.0
libtpu: 0.0.40
codegen_flags: <defaults>
</compile_context>

<pallas_src>
import functools
import math

import jax
import jax.numpy as jnp
import numpy as np
from jax import lax
from jax.experimental import pallas as pl
from jax.experimental.pallas import tpu as pltpu

ABLATION_VALUE = 100000.0


# ----------------------------- pass 1: conv + per-tile partial min -----------

def _make_conv_kernel(co, lane_tile, hw, hwp):
    masked = hwp != hw
    n_chunks = lane_tile // 128

    def kernel(x_ref, w_ref, b_ref, out_ref, pmin_ref):
        # x_ref   : (1, Ci, LT)     VMEM  lane tile of batch item b
        # w_ref   : (Co, Ci)        VMEM  1x1 conv weight
        # b_ref   : (Co, 1)         VMEM  conv bias
        # out_ref : (1, Co, LT)     VMEM  tiled conv output (pipelined writeback)
        # pmin_ref: (1, 1, Co, 128) VMEM  per-(b, t) partial min
        t = pl.program_id(1)

        y = jnp.dot(w_ref[...], x_ref[0],
                    preferred_element_type=jnp.float32) + b_ref[...]
        out_ref[0] = y.astype(out_ref.dtype)

        # Partial min folded 128 lanes at a time: pure VPU, no per-tile XLU
        # cross-lane reduce.  Padded lanes (hw..hwp) are masked to +inf.
        def chunk(c):
            yc = y[:, c * 128:(c + 1) * 128]
            if masked:
                lane = lax.broadcasted_iota(jnp.int32, (co, 128), 1)
                col = t * lane_tile + c * 128 + lane
                yc = jnp.where(col < hw, yc, jnp.inf)
            return yc

        pm = chunk(0)
        for c in range(1, n_chunks):
            pm = jnp.minimum(pm, chunk(c))
        pmin_ref[0, 0] = pm

    return kernel


# ----------------------------- pass 2: ablation-row scatter ------------------

def _ablate_kernel(idx_ref, vals_ref, conv_hbm_ref, out_ref):
    # idx_ref     : SMEM (B,) int32  (scalar prefetch; only used in the index_map)
    # vals_ref    : SMEM (B,) f32    ablation value per batch item
    # conv_hbm_ref: raw HBM ref, aliased to the output (never touched here)
    # out_ref     : VMEM (1, 1, nL, 128) -- the single ablated channel row
    del idx_ref, conv_hbm_ref
    b = pl.program_id(0)
    nl = out_ref.shape[2]
    out_ref[0, 0] = jnp.full((nl, 128), vals_ref[b], dtype=out_ref.dtype)


# ----------------------------- wrapper ---------------------------------------

def _pick_lane_tile(hwp, requested):
    """Largest multiple of 128 that divides hwp and is <= requested."""
    n_chunks = hwp // 128
    best = 1
    for d in range(1, n_chunks + 1):
        if n_chunks % d == 0 and d * 128 <= requested:
            best = d
    return best * 128


@functools.partial(jax.jit, static_argnames=("lane_tile",))
def ablation_layer(x, weight, bias, indices, *, lane_tile=2048):
    """x: (B, Ci, H, W) f32 NCHW; weight: (Co, Ci); bias: (Co,); indices: (B,) int.

    Note: out-of-range `indices` are not bounds-checked (Pallas does not
    runtime-check block indices) -- same contract as the PyTorch module.
    """
    B, Ci, H, W = x.shape
    Co = weight.shape[0]
    HW = H * W
    HWp = -(-HW // 128) * 128          # pad the spatial axis to a lane multiple
    pad = HWp - HW
    LT = _pick_lane_tile(HWp, max(int(lane_tile), 128))
    n_tiles = HWp // LT
    nL = HWp // 128

    x3 = x.reshape(B, Ci, HW).astype(jnp.float32)       # free (no transpose)
    if pad:
        x3 = jnp.pad(x3, ((0, 0), (0, 0), (0, pad)))    # only when HW % 128 != 0
    w2 = weight.astype(jnp.float32)
    b2 = bias.reshape(Co, 1).astype(jnp.float32)

    # ---- pass 1: tiled 1x1 conv + per-tile partial mins ----------------------
    conv_out, pmins = pl.pallas_call(
        _make_conv_kernel(Co, LT, HW, HWp),
        out_shape=(
            jax.ShapeDtypeStruct((B, Co, HWp), jnp.float32),
            jax.ShapeDtypeStruct((B, n_tiles, Co, 128), jnp.float32),
        ),
        grid_spec=pltpu.PrefetchScalarGridSpec(
            num_scalar_prefetch=0,
            grid=(B, n_tiles),
            in_specs=[
                pl.BlockSpec((1, Ci, LT), lambda b, t: (b, 0, t)),
                pl.BlockSpec((Co, Ci), lambda b, t: (0, 0)),
                pl.BlockSpec((Co, 1), lambda b, t: (0, 0)),
            ],
            out_specs=[
                pl.BlockSpec((1, Co, LT), lambda b, t: (b, 0, t)),
                pl.BlockSpec((1, 1, Co, 128), lambda b, t: (b, t, 0, 0)),
            ],
        ),
        compiler_params=pltpu.CompilerParams(
            dimension_semantics=("parallel", "parallel")),
    )(x3, w2, b2)

    # ---- exact scalar recurrence replacing the B sequential full-tensor mins -
    gmin = jnp.min(pmins)
    vals, m = [], gmin
    for _ in range(B):
        v = jnp.where(m == 0.0, jnp.float32(0.0), m - ABLATION_VALUE)
        vals.append(v)
        m = v                      # after the write, v is the new global min
    vals = jnp.stack(vals).astype(jnp.float32)           # (B,)

    # ---- pass 2: scatter the B ablation rows in place (aliased output) -------
    conv4d = conv_out.reshape(B, Co, nL, 128)
    out4d = pl.pallas_call(
        _ablate_kernel,
        out_shape=jax.ShapeDtypeStruct((B, Co, nL, 128), jnp.float32),
        grid_spec=pltpu.PrefetchScalarGridSpec(
            num_scalar_prefetch=1,                        # indices -> SMEM
            grid=(B,),
            in_specs=[
                pl.BlockSpec(memory_space=pltpu.MemorySpace.SMEM),  # vals
                pl.BlockSpec(memory_space=pl.ANY),                  # conv4d (aliased)
            ],
            out_specs=pl.BlockSpec(
                (1, 1, nL, 128), lambda b, idx: (b, idx[b], 0, 0)),
        ),
        # operand 2 (conv4d) is donated to output 0: untouched blocks keep the
        # conv results, only B rows of HWp floats are rewritten.
        input_output_aliases={2: 0},
        compiler_params=pltpu.CompilerParams(
            dimension_semantics=("arbitrary",)),
    )(indices.astype(jnp.int32), vals, conv4d)

    out = out4d.reshape(B, Co, HWp)
    if pad:
        out = out[:, :, :HW]       # drop lane padding (only for ragged HW)
    return out.reshape(B, Co, H, W)


def ablation_layer_ref(x, weight, bias, indices):
    """Pure-JAX reference mirroring the PyTorch __call__ exactly."""
    out = jnp.einsum("oc,bchw->bohw", weight, x) + bias[None, :, None, None]
    for i in range(x.shape[0]):
        m = jnp.min(out)
        val = jnp.where(m == 0.0, 0.0, m - ABLATION_VALUE)
        out = out.at[i, indices[i], :, :].set(val)
    return out


if __name__ == "__main__":
    key = jax.random.PRNGKey(0)
    k_x, k_w, k_b, k_x2 = jax.random.split(key, 4)

    B, Ci, Co, H, W = 2, 4, 8, 16, 16
    x = jax.random.normal(k_x, (B, Ci, H, W), dtype=jnp.float32)
    # deterministic synthetic Conv2d(4, 8, kernel_size=1) parameters
    fan_in = Ci
    bound = 1.0 / np.sqrt(fan_in)
    weight = jax.random.uniform(k_w, (Co, Ci), minval=-bound, maxval=bound,
                                dtype=jnp.float32)
    bias = jax.random.uniform(k_b, (Co,), minval=-bound, maxval=bound,
                              dtype=jnp.float32)
    indices = jnp.array([3, 5], dtype=jnp.int32)  # channel to ablate per item

    out = jax.block_until_ready(ablation_layer(x, weight, bias, indices))
    ref = jax.block_until_ready(ablation_layer_ref(x, weight, bias, indices))
    np.testing.assert_allclose(np.asarray(out), np.asarray(ref),
                               rtol=1e-5, atol=1e-5)

    # Edge case: global min == 0 (zero weights, bias with an exact-zero min)
    # exercises the `min == 0 -> write 0` branch of the recurrence.
    w0 = jnp.zeros((Co, Ci), jnp.float32)
    b0 = jnp.concatenate([jnp.zeros((1,), jnp.float32), jnp.abs(bias[1:]) + 0.5])
    out0 = jax.block_until_ready(ablation_layer(x, w0, b0, indices))
    ref0 = jax.block_until_ready(ablation_layer_ref(x, w0, b0, indices))
    np.testing.assert_allclose(np.asarray(out0), np.asarray(ref0),
                               rtol=1e-5, atol=1e-5)

    # Ragged spatial size (7x7 -> HW=49, padded to 128) exercises the masked
    # partial-min path and the pad/slice plumbing.
    x2 = jax.random.normal(k_x2, (B, Ci, 7, 7), dtype=jnp.float32)
    out2 = jax.block_until_ready(ablation_layer(x2, weight, bias, indices))
    ref2 = jax.block_until_ready(ablation_layer_ref(x2, weight, bias, indices))
    np.testing.assert_allclose(np.asarray(out2), np.asarray(ref2),
                               rtol=1e-5, atol=1e-5)

    print("KERNEL_OK")
</pallas_src>

<mosaic_0001>
module attributes {stable_mosaic.version = 11 : i64} {
  func.func @kernel(%arg0: i32, %arg1: i32, %arg2: memref<1x4x256xf32, #tpu.memory_space<vmem>>, %arg3: memref<8x4xf32, #tpu.memory_space<vmem>>, %arg4: memref<8x1xf32, #tpu.memory_space<vmem>>, %arg5: memref<1x8x256xf32, #tpu.memory_space<vmem>>, %arg6: memref<1x1x8x128xf32, #tpu.memory_space<vmem>>) attributes {dimension_semantics = [#tpu.dimension_semantics<parallel>, #tpu.dimension_semantics<parallel>], iteration_bounds = array<i64: 2, 1>, scalar_prefetch = 0 : i64, scratch_operands = 0 : i64, tpu.core_type = #tpu.core_type<tc>, window_params = [{transform_indices = @transform_0, window_bounds = array<i64: 1, 4, 256>}, {pipeline_mode = #tpu.pipeline_mode<synchronous>, transform_indices = @transform_1, window_bounds = array<i64: 8, 4>}, {pipeline_mode = #tpu.pipeline_mode<synchronous>, transform_indices = @transform_2, window_bounds = array<i64: 8, 1>}, {transform_indices = @transform_3, window_bounds = array<i64: 1, 8, 256>}, {transform_indices = @transform_4, window_bounds = array<i64: 1, 1, 8, 128>}]} {
    %c0 = arith.constant 0 : index
    %c0_0 = arith.constant 0 : index
    %0 = vector.load %arg3[%c0, %c0_0] : memref<8x4xf32, #tpu.memory_space<vmem>>, vector<8x4xf32>
    %c0_1 = arith.constant 0 : index
    %c0_2 = arith.constant 0 : index
    %c0_3 = arith.constant 0 : index
    %1 = vector.load %arg2[%c0_1, %c0_2, %c0_3] : memref<1x4x256xf32, #tpu.memory_space<vmem>>, vector<1x4x256xf32>
    %2 = vector.shape_cast %1 : vector<1x4x256xf32> to vector<4x256xf32>
    %cst = arith.constant dense<0.000000e+00> : vector<8x256xf32>
    %3 = tpu.matmul %0, %2, %cst {dimension_numbers = #tpu.dot_dimension_numbers<[1], [0], [0], [1], [0, 0, 1, 1], [], []>} : vector<8x4xf32>, vector<4x256xf32>, vector<8x256xf32> -> vector<8x256xf32>
    %c0_4 = arith.constant 0 : index
    %c0_5 = arith.constant 0 : index
    %4 = vector.load %arg4[%c0_4, %c0_5] : memref<8x1xf32, #tpu.memory_space<vmem>>, vector<8x1xf32>
    %5 = vector.broadcast %4 : vector<8x1xf32> to vector<8x256xf32>
    %6 = arith.addf %3, %5 : vector<8x256xf32>
    %c0_6 = arith.constant 0 : index
    %c0_7 = arith.constant 0 : index
    %c0_8 = arith.constant 0 : index
    %7 = vector.load %arg5[%c0_6, %c0_7, %c0_8] : memref<1x8x256xf32, #tpu.memory_space<vmem>>, vector<1x8x256xf32>
    %8 = vector.shape_cast %7 : vector<1x8x256xf32> to vector<8x256xf32>
    %9 = vector.shape_cast %6 : vector<8x256xf32> to vector<1x8x256xf32>
    tpu.vector_store %arg5[%c0_6, %c0_7, %c0_8], %9 {strides = array<i32>} : memref<1x8x256xf32, #tpu.memory_space<vmem>>, vector<1x8x256xf32>,
    %10 = vector.extract_strided_slice %6 {offsets = [0, 0], sizes = [8, 128], strides = [1, 1]} : vector<8x256xf32> to vector<8x128xf32>
    %11 = vector.extract_strided_slice %6 {offsets = [0, 128], sizes = [8, 128], strides = [1, 1]} : vector<8x256xf32> to vector<8x128xf32>
    %12 = arith.minimumf %10, %11 : vector<8x128xf32>
    %c0_9 = arith.constant 0 : index
    %c0_10 = arith.constant 0 : index
    %c0_11 = arith.constant 0 : index
    %c0_12 = arith.constant 0 : index
    %13 = vector.load %arg6[%c0_9, %c0_10, %c0_11, %c0_12] : memref<1x1x8x128xf32, #tpu.memory_space<vmem>>, vector<1x1x8x128xf32>
    %14 = vector.shape_cast %13 : vector<1x1x8x128xf32> to vector<8x128xf32>
    %15 = vector.shape_cast %12 : vector<8x128xf32> to vector<1x1x8x128xf32>
    tpu.vector_store %arg6[%c0_9, %c0_10, %c0_11, %c0_12], %15 {strides = array<i32>} : memref<1x1x8x128xf32, #tpu.memory_space<vmem>>, vector<1x1x8x128xf32>,
    return
  }
  func.func @transform_0(%arg0: i32, %arg1: i32) -> (i32, i32, i32) {
    %c0_i32 = arith.constant 0 : i32
    %c0_i32_0 = arith.constant 0 : i32
    return %arg0, %c0_i32, %arg1 : i32, i32, i32
  }
  func.func @transform_1(%arg0: i32, %arg1: i32) -> (i32, i32) {
    %c0_i32 = arith.constant 0 : i32
    %c0_i32_0 = arith.constant 0 : i32
    %c0_i32_1 = arith.constant 0 : i32
    return %c0_i32, %c0_i32_0 : i32, i32
  }
  func.func @transform_2(%arg0: i32, %arg1: i32) -> (i32, i32) {
    %c0_i32 = arith.constant 0 : i32
    %c0_i32_0 = arith.constant 0 : i32
    %c0_i32_1 = arith.constant 0 : i32
    return %c0_i32, %c0_i32_0 : i32, i32
  }
  func.func @transform_3(%arg0: i32, %arg1: i32) -> (i32, i32, i32) {
    %c0_i32 = arith.constant 0 : i32
    %c0_i32_0 = arith.constant 0 : i32
    return %arg0, %c0_i32, %arg1 : i32, i32, i32
  }
  func.func @transform_4(%arg0: i32, %arg1: i32) -> (i32, i32, i32, i32) {
    %c0_i32 = arith.constant 0 : i32
    %c0_i32_0 = arith.constant 0 : i32
    %c0_i32_1 = arith.constant 0 : i32
    return %arg0, %arg1, %c0_i32, %c0_i32_0 : i32, i32, i32, i32
  }
}

module attributes {stable_mosaic.version = 11 : i64} {
  func.func @_ablate_kernel(%arg0: i32, %arg1: memref<2xi32, #tpu.memory_space<smem>>, %arg2: memref<2xf32, #tpu.memory_space<smem>>, %arg3: memref<2x8x2x128xf32, #tpu.memory_space<any>>, %arg4: memref<1x1x2x128xf32, #tpu.memory_space<vmem>>) attributes {dimension_semantics = [#tpu.dimension_semantics<arbitrary>], iteration_bounds = array<i64: 2>, scalar_prefetch = 1 : i64, scratch_operands = 0 : i64, tpu.core_type = #tpu.core_type<tc>, window_params = [{transform_indices = @transform_0, window_bounds = array<i64: 2>}, {}, {transform_indices = @transform_2, window_bounds = array<i64: 1, 1, 2, 128>}]} {
    %0 = arith.index_cast %arg0 : i32 to index
    %1 = memref.load %arg2[%0] : memref<2xf32, #tpu.memory_space<smem>>
    %2 = vector.broadcast %1 : f32 to vector<2x128xf32>
    %c0 = arith.constant 0 : index
    %c0_0 = arith.constant 0 : index
    %c0_1 = arith.constant 0 : index
    %c0_2 = arith.constant 0 : index
    %3 = vector.load %arg4[%c0, %c0_0, %c0_1, %c0_2] : memref<1x1x2x128xf32, #tpu.memory_space<vmem>>, vector<1x1x2x128xf32>
    %4 = vector.shape_cast %3 : vector<1x1x2x128xf32> to vector<2x128xf32>
    %5 = vector.shape_cast %2 : vector<2x128xf32> to vector<1x1x2x128xf32>
    tpu.vector_store %arg4[%c0, %c0_0, %c0_1, %c0_2], %5 {strides = array<i32>} : memref<1x1x2x128xf32, #tpu.memory_space<vmem>>, vector<1x1x2x128xf32>,
    return
  }
  func.func @transform_0(%arg0: i32, %arg1: memref<2xi32, #tpu.memory_space<smem>>) -> i32 {
    %c0_i32 = arith.constant 0 : i32
    %c0_i32_0 = arith.constant 0 : i32
    return %c0_i32 : i32
  }
  func.func @transform_2(%arg0: i32, %arg1: memref<2xi32, #tpu.memory_space<smem>>) -> (i32, i32, i32, i32) {
    %0 = arith.index_cast %arg0 : i32 to index
    %1 = memref.load %arg1[%0] : memref<2xi32, #tpu.memory_space<smem>>
    %c0_i32 = arith.constant 0 : i32
    %c0_i32_0 = arith.constant 0 : i32
    %c0_i32_1 = arith.constant 0 : i32
    return %arg0, %1, %c0_i32, %c0_i32_0 : i32, i32, i32, i32
  }
}

</mosaic_0001>

<bundles_post_ra>
// kernel: ablation_layer.2
= control target key start
LH: loop header
LB: loop body
LE: loop exit
PB: predicated region body
PF: predicated region fallthrough
CT: control target
= control target key end

     0   :  { %s574_s15 = smov 0   ;;  %s576_s16 = smov 0   ;;  %s616_s0 = inlined_call_operand.vmem [shape: f32[2,4,256], index: 0, kind: input, shape index: {}]   ;;  %s617_s1 = inlined_call_operand.vmem [shape: f32[8,4], index: 1, kind: input, shape index: {}]   ;;  %s618_s2 = inlined_call_operand.vmem [shape: f32[8,1], index: 2, kind: input, shape index: {}]   ;;  %s619_s3 = inlined_call_operand.vmem [shape: f32[2,8,256], index: 3, kind: output, shape index: {0}]   ;;  %s620_s4 = inlined_call_operand.vmem [shape: f32[2,1,8,128], index: 4, kind: output, shape index: {1}]  }
   0x1   :  { %s578_s17 = smov 0  }
   0x2 LB: > { %s27_s18 = sadd.s32 1, %s541_s16  ;;  %p482_p0 = scmp.ge.s32.totalorder %s545_s17, 1  ;;  %s545_s17 = sphi %s578_s17, %s15_s17   ;;  %s541_s16 = sphi %s576_s16, %s622_s16   ;;  %s537_s15 = sphi %s574_s15, %s621_s15  }
   0x3   : > { %p29_p1 = scmp.ge.s32.totalorder %s27_s18, 2  ;;  %p188_p2 = scmp.lt.s32.totalorder %s545_s17, 3 }
   0x5   : > { %s624_s18 = smov (%p29_p1, %s27_s18), 0  ;;  %p189_p3 = pnand %p482_p0, %p188_p2 }
   0x6   : > { %p230_p4 = scmp.lt.s32.totalorder (!%p189_p3), %s537_s15, 1 }
   0x7   : > { %192 = sbr.rel (%p189_p3) target bundleno = 220 (0xdc), region = 32 }
   0xc   : > { %v547_v0 = vmov 0.0   ;;  %v548_v1 = vmov 0   ;;  %v258_v2 = vld [vmem:[%s618_s2] sm:$0xff]  ;;  %s626_s15 = smov (!%p230_p4, %s537_s15), 1  ;;  %vm270_vm0 = vcmask 1043456   ;;  %vm266_vm1 = vcmask 31744  }
   0xd   : > { %339 = vmatprep.mubr.f32.mxu0 %v547_v0  ;;  %521 = vset.pattern.permute.xlu0 %v548_v1  ;;  %s493_s21 = sshll.u32 %s626_s15, 3  ;;  %v256_v5 = vld [vmem:[%s617_s1] sm:$0xff]  ;;  %s494_s27 = sshll.u32 %s626_s15, 4 }
   0xe   : > { %261 = vperm.xlu0 %521, %v258_v2   ;;  %s237_s24 = scalar_lea.vmem %s616_s0, %s493_s21  ;;  %s247_s30 = scalar_lea.vmem %s619_s3, %s494_s27 }
   0xf   : > { %v257_v3 = vld [vmem:[%s237_s24] sm:$0xff]  ;;  %s255_s7 = scalar_lea.vmem %s620_s4, %s493_s21 }
  0x10   : > { %v265_v4 = vcombine.high %v257_v3, %v257_v3 }
  0x12   : > { %488 = vmatprep.subr.msk.mxu0 %vm270_vm0, %v265_v4 }
  0x13   : > { %489 = vmatpush1.msk.msra.mxu0 %vm270_vm0, %v257_v3 }
  0x14   : > { %490 = vmatmul.mubr.msk.f32.vlgmr.msra.gmra.mxu0 %vm266_vm1, %v256_v5 }
  0x89   : > { %v262_v6 = vpop.permute.xlu0 %261 }
  0xd4   : > { %v341_v7 = vpop.f32.mrf.mxu0 }
  0xd5   : > { %v342_v8 = vadd.f32 %v341_v7, %v262_v6 }
  0xd6   : > { %v343_v9 = vpop.f32.mrf.mxu0 }
  0xd7   : > { %346 = vst [vmem:[%s247_s30] sm:$0xff] %v342_v8  ;;  %v344_v10 = vadd.f32 %v343_v9, %v262_v6 }
  0xd9   : > { %347 = vst [vmem:[%s247_s30 + $0x8] sm:$0xff] %v344_v10  ;;  %v348_v11 = vmin.f32 %v342_v8, %v344_v10 }
  0xdb   : > { %349 = vst [vmem:[%s255_s7] sm:$0xff] %v348_v11 }
  0xdc PF: > { %s15_s17 = sadd.s32 1, %s545_s17   ;;  %s621_s15 = smov %s541_s16 }
  0xdd   : > { %p12_p5 = scmp.ge.s32.totalorder %s15_s17, 4   ;;  %s622_s16 = smov %s624_s18 }
  0xdf   :  { %14 = sbr.rel (!%p12_p5) target bundleno = 2 (0x2), region = 74 }

// kernel: ablation_layer.3
= control target key start
LH: loop header
LB: loop body
LE: loop exit
PB: predicated region body
PF: predicated region fallthrough
CT: control target
= control target key end

     0   :  { %s331_s0 = inlined_call_operand.vmem [shape: s32[2], index: 0, kind: input, shape index: {}]   ;;  %s332_s1 = inlined_call_operand.vmem [shape: f32[2], index: 1, kind: input, shape index: {}]   ;;  %s333_s2 = inlined_call_operand.vmem [shape: f32[2,8,2,128], index: 2, kind: input, shape index: {}, may-alias: {2,3}]   ;;  %s334_s3 = inlined_call_operand.vmem [shape: f32[2,8,2,128], index: 3, kind: output, shape index: {}, may-alias: {2,3}]  }
   0x1   :  { %s8_s14 = sshll.u32 %s331_s0, 4  ;;  %s9_s14 = int_to_ptr.vmem [resolvable:$true] %s8_s14 }
   0x2   :  { %s237_s15 = scalar_lea.vmem %s9_s14, 16  ;;  %p242_p1 = scmp.lt.s32.totalorder %s9_s14, %s9_s14 }
   0x3   :  { %p238_p0 = scmp.ne.s32.totalorder %s9_s14, %s237_s15  ;;  %p243_p2 = scmp.lt.s32.totalorder %s237_s15, %s237_s15 }
   0x5   :  { %p244_p3 = por %p243_p2, %p242_p1 }
   0x7   :  { %p245_p4 = pnand %p244_p3, %p238_p0 }
   0x9   :  { %248 = shalt.err (!%p245_p4)  }
   0xa   :  { %s278_s16 = smov [#allocation3]  }
   0xb   :  { %11 = dma.vmem_to_smem %s9_s14, 16, %s278_s16, [#allocation2] }
   0xc   :  { %268 = dma.done.wait [#allocation2], 16 }
   0xd   :  { %269 = vsyncadd [#allocation2], 4294967280 }
   0xe   :  { %13 = sfence }
   0xf   :  { %14 = vsyncpa [#allocation5], 0  ;;  %s303_s2 = smov 0  }
  0x10 LB: > { %s207_s0 = sadd.s32 4294967295, %s276_s2   ;;  %p209_p5 = scmp.ge.s32.totalorder %s276_s2, 1  ;;  %s276_s2 = sphi %s303_s2, %s20_s2  }
  0x11   : > { %p76_p6 = scmp.lt.s32.totalorder %s276_s2, 3  ;;  %s89_s19 = sshll.u32 %s332_s1, 4  ;;  %s90_s19 = int_to_ptr.vmem [resolvable:$true] %s89_s19 }
  0x12   : > { %p225_p8 = scmp.eq.s32.totalorder %s207_s0, 0  ;;  %s249_s21 = scalar_lea.vmem %s90_s19, 16 }
  0x13   : > { %p314_p7 = pnand %p209_p5, %p76_p6  ;;  %p250_p11 = scmp.ne.s32.totalorder %s90_s19, %s249_s21 }
  0x14   : > { %p257_p1 = scmp.lt.s32.totalorder %s90_s19, %s90_s19  ;;  %p258_p2 = scmp.lt.s32.totalorder %s249_s21, %s249_s21 }
  0x15   : > { %p221_p9 = pneg %p314_p7 }
  0x16   : > { %p259_p3 = por %p258_p2, %p257_p1 }
  0x17   : > { %p222_p10 = pnand %p225_p8, %p221_p9 }
  0x19   : > { %p251_p12 = pneg %p222_p10 }
  0x1b   : > { %p252_p13 = pnand %p251_p12, %p250_p11 }
  0x1d   : > { %p253_p0 = pneg %p252_p13 }
  0x1f   : > { %p260_p4 = pnand %p259_p3, %p253_p0 }
  0x21   : > { %263 = shalt.err (!%p260_p4)
}
  0x22   : > { %s279_s22 = smov [#allocation4]   ;;  %102 = sbr.rel (%p314_p7) target bundleno = 55 (0x37), region = 24 }
  0x23   : > { %224 = dma.vmem_to_smem (!%p222_p10), %s90_s19, 16, %s279_s22, [#allocation5]  }
  0x27   : > { %271 = dma.done.wait (%p225_p8), [#allocation5], 16  }
  0x28   : > { %273 = vsyncadd (%p225_p8), [#allocation5], 4294967280 }
  0x29   : > { %108 = sfence }
  0x2a   : > { %s122_s23 = sld [smem:[#allocation3 + %s207_s0]]  ;;  %p123_p5 = scmp.lt.s32.totalorder %s207_s0, 1 }
  0x2b   : > { %s132_s24 = sld [smem:[#allocation4 + %s207_s0]] }
  0x2c   : > { %s337_s0 = smov (!%p123_p5, %s207_s0), 1 }
  0x2d   : > { %s213_s25 = sshll.u32 %s337_s0, 3 }
  0x30   : > { %p125_p6 = scmp.lt.s32.totalorder %s122_s23, 7 }
  0x31   : > { %v133_v0 = vstv %s132_s24 }
  0x32   : > { %s339_s23 = smov (!%p125_p6, %s122_s23), 7 }
  0x33   : > { %s128_s26 = sadd.s32 %s213_s25, %s339_s23 }
  0x34   : > { %s214_s27 = sshll.u32 %s128_s26, 1 }
  0x35   : > { %s130_s30 = scalar_lea.vmem %s334_s3, %s214_s27 }
  0x36   : > { %134 = vst [vmem:[%s130_s30] sm:$0x3] %v133_v0 }
  0x37 PF: > { %s20_s2 = sadd.s32 1, %s276_s2  }
  0x38   : > { %p17_p7 = scmp.ge.s32.totalorder %s20_s2, 4  }
  0x3a   :  { %19 = sbr.rel (!%p17_p7) target bundleno = 16 (0x10), region = 56 }
  0x3f   :  { %165 = vsyncpa [#allocation5], 1 }
  0x40   :  { %167 = vsyncpa [#allocation5 + $0x1], 1 }

</bundles_post_ra>
